<compile_context>
chip_gen: v7x
topology: tpu7x:2x2x1
jax: 0.10.0
libtpu: 0.0.40
codegen_flags: <defaults>
</compile_context>

<pallas_src>
import functools

import jax
import jax.numpy as jnp
from jax.experimental import pallas as pl
from jax.experimental.pallas import tpu as pltpu


_VMEM_LIMIT = 48 * 1024 * 1024   # explicit scoped-VMEM limit (safe on v5e/v6e/v7x)
_TM_BUDGET = 20 * 1024 * 1024    # per-kernel activation-stream budget when picking TM
_LANE = 128


def _round_up(x, m):
    return (x + m - 1) // m * m


def _choose_tm(m, k, ocp, out_bytes, *, budget=_TM_BUDGET, cap=1024):
    """Largest M-tile (multiple of 16) whose double-buffered streams fit the budget."""
    fixed = 2 * k * ocp * 2 + 4 * ocp * 4                # weight (bf16, 2 bufs) + bias/stats
    per_row = 2 * (k * 2 + ocp * out_bytes)              # patches (bf16) + out, 2 bufs each
    avail = max(budget - fixed, 16 * per_row)
    tm = int(max(16, min(cap, (avail // per_row) // 16 * 16)))
    return min(tm, _round_up(m, 16))


# ---------------------------------------------------------------------------
# Pallas kernels
# ---------------------------------------------------------------------------
def _conv_mm_kernel(p_ref, w_ref, b_ref, o_ref, *stats_refs,
                    fuse_lrelu, slope, compute_stats, m_real, tm):
    """[TM,K](bf16) @ [K,OCp](bf16) -> f32 acc, + bias, optional LeakyReLU.

    When compute_stats, also emits this tile's per-channel sum and sum-of-squares
    (pre-activation, f32) so BatchNorm stats never require re-reading the
    activation from HBM.
    """
    acc = jnp.dot(p_ref[...], w_ref[...], preferred_element_type=jnp.float32)
    acc = acc + b_ref[...]
    if fuse_lrelu:
        acc = jnp.where(acc >= 0, acc, slope * acc)
    o_ref[...] = acc.astype(o_ref.dtype)

    if compute_stats:
        (stats_ref,) = stats_refs
        # Mask rows that exist only because M was padded up to a multiple of TM.
        row = pl.program_id(0) * tm + jax.lax.broadcasted_iota(jnp.int32, (tm, 1), 0)
        xm = acc * (row < m_real).astype(jnp.float32)
        s1 = jnp.sum(xm, axis=0, keepdims=True)          # [1, OCp]  sum
        s2 = jnp.sum(xm * xm, axis=0, keepdims=True)     # [1, OCp]  sum of squares
        stats_ref[...] = jnp.concatenate([s1, s2], axis=0)[None].astype(stats_ref.dtype)


def _affine_lrelu_kernel(x_ref, s_ref, t_ref, o_ref, *, slope):
    """Per-channel affine (BatchNorm scale/shift) + LeakyReLU, f32 math, bf16 store."""
    y = x_ref[...].astype(jnp.float32) * s_ref[...] + t_ref[...]
    o_ref[...] = jnp.where(y >= 0, y, slope * y).astype(o_ref.dtype)


# ---------------------------------------------------------------------------
# Wrappers (glue: im2col, padding, parameter plumbing)
# ---------------------------------------------------------------------------
def _im2col(x_nhwc, kh, kw, stride, pad):
    x = jnp.pad(x_nhwc, ((0, 0), (pad, pad), (pad, pad), (0, 0)))
    B, H, W, C = x.shape
    oh = (H - kh) // stride + 1
    ow = (W - kw) // stride + 1
    cols = []
    for i in range(kh):
        for j in range(kw):
            cols.append(x[:, i:i + stride * oh:stride, j:j + stride * ow:stride, :])
    p = jnp.stack(cols, axis=3)                          # [B, oh, ow, kh*kw, C]
    return p.reshape(B * oh * ow, kh * kw * C), oh, ow


def conv2d_pallas(x_nhwc, w_oihw, bias, stride, pad, *,
                  fuse_lrelu=False, slope=0.2, compute_stats=False,
                  out_dtype=jnp.float32):
    OC, IC, KH, KW = w_oihw.shape
    # bf16 conv inputs (matches the reference math); keeps the im2col buffer bf16.
    patches, oh, ow = _im2col(x_nhwc.astype(jnp.bfloat16), KH, KW, stride, pad)
    M, K = patches.shape
    OCp = _round_up(OC, _LANE)                           # lane-dense output columns
    out_bytes = jnp.dtype(out_dtype).itemsize
    TM = _choose_tm(M, K, OCp, out_bytes)
    Mp = _round_up(M, TM)
    n_tiles = Mp // TM

    if Mp != M:
        patches = jnp.pad(patches, ((0, Mp - M), (0, 0)))

    wmat = jnp.transpose(w_oihw, (2, 3, 1, 0)).reshape(K, OC)
    wmat = jnp.pad(wmat, ((0, 0), (0, OCp - OC))).astype(jnp.bfloat16)
    bfull = bias if bias is not None else jnp.zeros((OC,), jnp.float32)
    bvec = jnp.pad(bfull.astype(jnp.float32).reshape(1, OC), ((0, 0), (0, OCp - OC)))

    kern = functools.partial(_conv_mm_kernel, fuse_lrelu=fuse_lrelu, slope=slope,
                             compute_stats=compute_stats, m_real=M, tm=TM)

    out_shape = jax.ShapeDtypeStruct((Mp, OCp), out_dtype)
    out_spec = pl.BlockSpec((TM, OCp), lambda i: (i, 0))
    if compute_stats:
        out_shape = (out_shape, jax.ShapeDtypeStruct((n_tiles, 2, OCp), jnp.float32))
        out_spec = (out_spec, pl.BlockSpec((1, 2, OCp), lambda i: (i, 0, 0)))

    res = pl.pallas_call(
        kern,
        out_shape=out_shape,
        grid=(n_tiles,),
        in_specs=[
            pl.BlockSpec((TM, K), lambda i: (i, 0)),     # patch tile (pipelined over M)
            pl.BlockSpec((K, OCp), lambda i: (0, 0)),    # weight (grid-invariant, resident)
            pl.BlockSpec((1, OCp), lambda i: (0, 0)),    # bias
        ],
        out_specs=out_spec,
        compiler_params=pltpu.CompilerParams(
            dimension_semantics=("parallel",),
            vmem_limit_bytes=_VMEM_LIMIT),
    )(patches, wmat, bvec)

    if compute_stats:
        out, stats = res
        sums = jnp.sum(stats, axis=0)[:, :OC]            # [2, OC] global sum / sumsq
    else:
        out, sums = res, None
    return out, oh, ow, M, TM, sums


def bn_apply_lrelu_pallas(x_pad, scale, shift, tm, *, slope=0.2,
                          out_dtype=jnp.bfloat16):
    """Apply precomputed BatchNorm scale/shift + LeakyReLU, tiled & lane-dense."""
    Mp, Cp = x_pad.shape
    C = scale.shape[0]
    s = jnp.pad(scale.astype(jnp.float32).reshape(1, C), ((0, 0), (0, Cp - C)))
    t = jnp.pad(shift.astype(jnp.float32).reshape(1, C), ((0, 0), (0, Cp - C)))
    return pl.pallas_call(
        functools.partial(_affine_lrelu_kernel, slope=slope),
        out_shape=jax.ShapeDtypeStruct((Mp, Cp), out_dtype),
        grid=(Mp // tm,),
        in_specs=[
            pl.BlockSpec((tm, Cp), lambda i: (i, 0)),
            pl.BlockSpec((1, Cp), lambda i: (0, 0)),
            pl.BlockSpec((1, Cp), lambda i: (0, 0)),
        ],
        out_specs=pl.BlockSpec((tm, Cp), lambda i: (i, 0)),
        compiler_params=pltpu.CompilerParams(
            dimension_semantics=("parallel",),
            vmem_limit_bytes=_VMEM_LIMIT),
    )(x_pad, s, t)


# ---------------------------------------------------------------------------
# Parameter construction (deterministic, synthetic; mirrors NLayerDiscriminator)
# ---------------------------------------------------------------------------
def make_params(key, input_nc, ndf=8, n_layers=3):
    params = []
    k = key

    def nrm(k, shape, scale=0.05):
        return scale * jax.random.normal(k, shape, dtype=jnp.float32)

    # layer 0: Conv(input_nc -> ndf, k4 s2 p1, bias=True) + LeakyReLU
    k, k1, k2 = jax.random.split(k, 3)
    params.append(dict(kind="conv_lrelu", stride=2,
                       w=nrm(k1, (ndf, input_nc, 4, 4)), b=nrm(k2, (ndf,))))

    nf_mult = 1
    for n in range(1, n_layers):
        nf_prev, nf_mult = nf_mult, min(2 ** n, 8)
        k, k1, k2, k3 = jax.random.split(k, 4)
        params.append(dict(kind="conv_bn_lrelu", stride=2,
                           w=nrm(k1, (ndf * nf_mult, ndf * nf_prev, 4, 4)), b=None,
                           gamma=1.0 + nrm(k2, (ndf * nf_mult,), 0.02),
                           beta=nrm(k3, (ndf * nf_mult,), 0.02)))

    nf_prev, nf_mult = nf_mult, min(2 ** n_layers, 8)
    k, k1, k2, k3 = jax.random.split(k, 4)
    params.append(dict(kind="conv_bn_lrelu", stride=1,
                       w=nrm(k1, (ndf * nf_mult, ndf * nf_prev, 4, 4)), b=None,
                       gamma=1.0 + nrm(k2, (ndf * nf_mult,), 0.02),
                       beta=nrm(k3, (ndf * nf_mult,), 0.02)))

    # final: Conv(ndf*nf_mult -> 1, k4 s1 p1, bias=True)
    k, k1, k2 = jax.random.split(k, 3)
    params.append(dict(kind="conv", stride=1,
                       w=nrm(k1, (1, ndf * nf_mult, 4, 4)), b=nrm(k2, (1,))))
    return params


def nlayer_discriminator_forward(x_nchw, params, slope=0.2, eps=1e-5):
    x = jnp.transpose(x_nchw, (0, 2, 3, 1)).astype(jnp.float32)   # NCHW -> NHWC
    B = x.shape[0]
    for idx, p in enumerate(params):
        OC = p["w"].shape[0]
        last = idx == len(params) - 1
        if p["kind"] == "conv_bn_lrelu":
            # Pre-norm conv output stays f32 (BN exactness); affine pass stores bf16.
            out, oh, ow, M, tm, stats = conv2d_pallas(
                x, p["w"], None, p["stride"], 1, compute_stats=True, slope=slope,
                out_dtype=jnp.float32)
            mean = stats[0] / M
            var = jnp.maximum(stats[1] / M - mean * mean, 0.0)    # biased batch variance
            scale = p["gamma"] * jax.lax.rsqrt(var + eps)
            shift = p["beta"] - mean * scale
            out = bn_apply_lrelu_pallas(out, scale, shift, tm, slope=slope,
                                        out_dtype=jnp.bfloat16)
        else:
            fuse = p["kind"] == "conv_lrelu"
            out, oh, ow, M, tm, _ = conv2d_pallas(
                x, p["w"], p["b"], p["stride"], 1, fuse_lrelu=fuse, slope=slope,
                out_dtype=jnp.float32 if last else jnp.bfloat16)
        x = out[:M, :OC].reshape(B, oh, ow, OC)                   # drop M/OC padding
    return jnp.transpose(x, (0, 3, 1, 2)).astype(jnp.float32)     # NHWC -> NCHW


# ---------------------------------------------------------------------------
# Pure-JAX reference (bf16 conv inputs, f32 accumulation, to match kernel math)
# ---------------------------------------------------------------------------
def _ref_conv(x_nhwc, w_oihw, bias, stride, pad):
    w_hwio = jnp.transpose(w_oihw, (2, 3, 1, 0))
    y = jax.lax.conv_general_dilated(
        x_nhwc.astype(jnp.bfloat16), w_hwio.astype(jnp.bfloat16),
        (stride, stride), [(pad, pad), (pad, pad)],
        dimension_numbers=("NHWC", "HWIO", "NHWC"),
        preferred_element_type=jnp.float32)
    if bias is not None:
        y = y + bias.reshape(1, 1, 1, -1)
    return y


def _ref_forward(x_nchw, params, slope=0.2, eps=1e-5):
    x = jnp.transpose(x_nchw, (0, 2, 3, 1)).astype(jnp.float32)
    for p in params:
        x = _ref_conv(x, p["w"], p["b"], p["stride"], 1)
        if p["kind"] == "conv_bn_lrelu":
            mean = jnp.mean(x, axis=(0, 1, 2), keepdims=True)
            var = jnp.mean((x - mean) ** 2, axis=(0, 1, 2), keepdims=True)
            x = (x - mean) * jax.lax.rsqrt(var + eps)
            x = x * p["gamma"].reshape(1, 1, 1, -1) + p["beta"].reshape(1, 1, 1, -1)
        if p["kind"] in ("conv_lrelu", "conv_bn_lrelu"):
            x = jnp.where(x >= 0, x, slope * x)
    return jnp.transpose(x, (0, 3, 1, 2))


# ---------------------------------------------------------------------------
if __name__ == "__main__":
    key = jax.random.PRNGKey(0)
    kx, kp = jax.random.split(key)

    # Small config consistent with the module: input_nc=4, ndf=8, n_layers=3.
    # Spatial 32 so all 5 convs (strides 2,2,2,1,1 with k=4, p=1) are valid.
    B, C, H, W = 2, 4, 32, 32
    x = jax.random.normal(kx, (B, C, H, W), dtype=jnp.float32)
    params = make_params(kp, input_nc=C, ndf=8, n_layers=3)

    out = jax.block_until_ready(nlayer_discriminator_forward(x, params))

    # Expected PatchGAN prediction map shape: [B, 1, 2, 2] for 32x32 input.
    assert out.shape == (B, 1, 2, 2), out.shape

    ref = jax.block_until_ready(_ref_forward(x, params))
    max_err = float(jnp.max(jnp.abs(out - ref)))
    assert jnp.allclose(out, ref, atol=2e-2, rtol=2e-2), max_err

    print("KERNEL_OK")
</pallas_src>

<mosaic_0001>
module attributes {stable_mosaic.version = 11 : i64} {
  func.func @_conv_mm_kernel(%arg0: i32, %arg1: memref<512x64xbf16, #tpu.memory_space<vmem>>, %arg2: memref<64x128xbf16, #tpu.memory_space<vmem>>, %arg3: memref<1x128xf32, #tpu.memory_space<vmem>>, %arg4: memref<512x128xbf16, #tpu.memory_space<vmem>>) attributes {dimension_semantics = [#tpu.dimension_semantics<parallel>], iteration_bounds = array<i64: 1>, scalar_prefetch = 0 : i64, scratch_operands = 0 : i64, tpu.core_type = #tpu.core_type<tc>, window_params = [{transform_indices = @transform_0, window_bounds = array<i64: 512, 64>}, {pipeline_mode = #tpu.pipeline_mode<synchronous>, transform_indices = @transform_1, window_bounds = array<i64: 64, 128>}, {pipeline_mode = #tpu.pipeline_mode<synchronous>, transform_indices = @transform_2, window_bounds = array<i64: 1, 128>}, {transform_indices = @transform_3, window_bounds = array<i64: 512, 128>}]} {
    %c0 = arith.constant 0 : index
    %c0_0 = arith.constant 0 : index
    %0 = vector.load %arg1[%c0, %c0_0] : memref<512x64xbf16, #tpu.memory_space<vmem>>, vector<512x64xbf16>
    %c0_1 = arith.constant 0 : index
    %c0_2 = arith.constant 0 : index
    %1 = vector.load %arg2[%c0_1, %c0_2] : memref<64x128xbf16, #tpu.memory_space<vmem>>, vector<64x128xbf16>
    %cst = arith.constant dense<0.000000e+00> : vector<512x128xf32>
    %2 = tpu.matmul %0, %1, %cst {dimension_numbers = #tpu.dot_dimension_numbers<[1], [0], [0], [1], [0, 0, 1, 1], [], []>} : vector<512x64xbf16>, vector<64x128xbf16>, vector<512x128xf32> -> vector<512x128xf32>
    %c0_3 = arith.constant 0 : index
    %c0_4 = arith.constant 0 : index
    %3 = vector.load %arg3[%c0_3, %c0_4] : memref<1x128xf32, #tpu.memory_space<vmem>>, vector<1x128xf32>
    %4 = vector.broadcast %3 : vector<1x128xf32> to vector<512x128xf32>
    %5 = arith.addf %2, %4 : vector<512x128xf32>
    %cst_5 = arith.constant 0.000000e+00 : f32
    %6 = vector.broadcast %cst_5 : f32 to vector<512x128xf32>
    %7 = arith.cmpf oge, %5, %6 : vector<512x128xf32>
    %cst_6 = arith.constant 2.000000e-01 : f32
    %8 = vector.broadcast %cst_6 : f32 to vector<512x128xf32>
    %9 = arith.mulf %8, %5 : vector<512x128xf32>
    %10 = arith.select %7, %5, %9 : vector<512x128xi1>, vector<512x128xf32>
    %11 = arith.truncf %10 : vector<512x128xf32> to vector<512x128xbf16>
    %c0_7 = arith.constant 0 : index
    %c0_8 = arith.constant 0 : index
    %12 = vector.load %arg4[%c0_7, %c0_8] : memref<512x128xbf16, #tpu.memory_space<vmem>>, vector<512x128xbf16>
    tpu.vector_store %arg4[%c0_7, %c0_8], %11 {strides = array<i32>} : memref<512x128xbf16, #tpu.memory_space<vmem>>, vector<512x128xbf16>,
    return
  }
  func.func @transform_0(%arg0: i32) -> (i32, i32) {
    %c0_i32 = arith.constant 0 : i32
    %c0_i32_0 = arith.constant 0 : i32
    return %arg0, %c0_i32 : i32, i32
  }
  func.func @transform_1(%arg0: i32) -> (i32, i32) {
    %c0_i32 = arith.constant 0 : i32
    %c0_i32_0 = arith.constant 0 : i32
    %c0_i32_1 = arith.constant 0 : i32
    return %c0_i32, %c0_i32_0 : i32, i32
  }
  func.func @transform_2(%arg0: i32) -> (i32, i32) {
    %c0_i32 = arith.constant 0 : i32
    %c0_i32_0 = arith.constant 0 : i32
    %c0_i32_1 = arith.constant 0 : i32
    return %c0_i32, %c0_i32_0 : i32, i32
  }
  func.func @transform_3(%arg0: i32) -> (i32, i32) {
    %c0_i32 = arith.constant 0 : i32
    %c0_i32_0 = arith.constant 0 : i32
    return %arg0, %c0_i32 : i32, i32
  }
}

</mosaic_0001>

<bundles_post_ra>
// kernel: tpu_custom_call.1
= control target key start
LH: loop header
LB: loop body
LE: loop exit
PB: predicated region body
PF: predicated region fallthrough
CT: control target
= control target key end

     0   :  { %vm279_vm0 = vcmask 523264   ;;  %s2014_s0 = inlined_call_operand.vmem [shape: bf16[512,64], index: 0, kind: input, shape index: {}]   ;;  %s2015_s1 = inlined_call_operand.vmem [shape: bf16[64,128], index: 1, kind: input, shape index: {}]   ;;  %s2016_s2 = inlined_call_operand.vmem [shape: f32[1,128], index: 2, kind: input, shape index: {}]   ;;  %s2017_s3 = inlined_call_operand.hbm [shape: bf16[512,128], index: 3, kind: output, shape index: {}]  }
   0x1   :  { %v1700_v0 = vld [vmem:[%s2015_s1] sm:$0xff]   ;;  %v1701_v1 = vld [vmem:[%s2015_s1 + $0x8] sm:$0xff]   ;;  %v1702_v2 = vld [vmem:[%s2015_s1 + $0x10] sm:$0xff]  }
   0x2   :  { %1617 = vmatprep.subr.bf16.mxu0 %v1700_v0  ;;  %1689 = vmatprep.subr.bf16.mxu1 %v1700_v0  ;;  %v1704_v3 = vld [vmem:[%s2014_s0] sm:$0xff]   ;;  %v1703_v5 = vld [vmem:[%s2015_s1 + $0x18] sm:$0xff]   ;;  %v1706_v6 = vld [vmem:[%s2014_s0 + $0x8] sm:$0xff]  }
   0x3   :  { %1618 = vmatpush3.bf16.msra.mxu0 %v1700_v0  ;;  %1693 = vmatpush3.bf16.msra.mxu1 %v1700_v0  ;;  %v1705_v4 = vld [vmem:[%s2014_s0 + $0x80] sm:$0xff]   ;;  %v1707_v7 = vld [vmem:[%s2014_s0 + $0x88] sm:$0xff]   ;;  %v1708_v8 = vld [vmem:[%s2014_s0 + $0x10] sm:$0xff]  }
   0x4   :  { %1619 = vmatprep.subr.bf16.mxu0 %v1701_v1  ;;  %1690 = vmatprep.subr.bf16.mxu1 %v1701_v1  ;;  %v1709_v9 = vld [vmem:[%s2014_s0 + $0x90] sm:$0xff]   ;;  %v1710_v10 = vld [vmem:[%s2014_s0 + $0x18] sm:$0xff]   ;;  %v1712_v12 = vld [vmem:[%s2014_s0 + $0x20] sm:$0xff]  }
   0x5   :  { %1625 = vmatprep.mubr.msk.bf16.mxu0 %vm279_vm0, %v1704_v3  ;;  %1657 = vmatprep.mubr.msk.bf16.mxu1 %vm279_vm0, %v1705_v4  ;;  %v1711_v11 = vld [vmem:[%s2014_s0 + $0x98] sm:$0xff]   ;;  %v1713_v13 = vld [vmem:[%s2014_s0 + $0xa0] sm:$0xff]   ;;  %v1714_v14 = vld [vmem:[%s2014_s0 + $0x28] sm:$0xff]  }
   0x6   :  { %v1715_v15 = vld [vmem:[%s2014_s0 + $0xa8] sm:$0xff]   ;;  %v1716_v16 = vld [vmem:[%s2014_s0 + $0x30] sm:$0xff]  }
   0x7   :  { %1620 = vmatpush3.bf16.msra.mxu0 %v1701_v1  ;;  %1694 = vmatpush3.bf16.msra.mxu1 %v1701_v1  ;;  %v1717_v17 = vld [vmem:[%s2014_s0 + $0xb0] sm:$0xff]  }
   0x8   :  { %1621 = vmatprep.subr.bf16.mxu0 %v1702_v2  ;;  %1691 = vmatprep.subr.bf16.mxu1 %v1702_v2 }
   0xb   :  { %1622 = vmatpush3.bf16.msra.mxu0 %v1702_v2  ;;  %1695 = vmatpush3.bf16.msra.mxu1 %v1702_v2 }
   0xc   :  { %1623 = vmatprep.subr.bf16.mxu0 %v1703_v5  ;;  %1692 = vmatprep.subr.bf16.mxu1 %v1703_v5 }
   0xf   :  { %1624 = vmatpush3.bf16.msra.mxu0 %v1703_v5  ;;  %1696 = vmatpush3.bf16.msra.mxu1 %v1703_v5 }
  0x12   :  { %1626 = vmatmul.mubr.msk.bf16.vlgmr.msra.gmra.mrb[0].mxu0 %vm279_vm0, %v1706_v6  ;;  %1658 = vmatmul.mubr.msk.bf16.vlgmr.msra.gmra.mrb[0].mxu1 %vm279_vm0, %v1707_v7 }
  0x13   :  { %1629 = vmatprep.mubr.msk.bf16.mxu0 %vm279_vm0, %v1708_v8  ;;  %1661 = vmatprep.mubr.msk.bf16.mxu1 %vm279_vm0, %v1709_v9 }
  0x1a   :  { %1630 = vmatmul.mubr.msk.bf16.gmra.mrb[4].mxu0 %vm279_vm0, %v1710_v10  ;;  %1662 = vmatmul.mubr.msk.bf16.gmra.mrb[4].mxu1 %vm279_vm0, %v1711_v11 }
  0x1b   :  { %1633 = vmatprep.mubr.msk.bf16.mxu0 %vm279_vm0, %v1712_v12  ;;  %1665 = vmatprep.mubr.msk.bf16.mxu1 %vm279_vm0, %v1713_v13 }
  0x22   :  { %1634 = vmatmul.mubr.msk.bf16.gmra.mrb[8].mxu0 %vm279_vm0, %v1714_v14  ;;  %1666 = vmatmul.mubr.msk.bf16.gmra.mrb[8].mxu1 %vm279_vm0, %v1715_v15 }
  0x23   :  { %1637 = vmatprep.mubr.msk.bf16.mxu0 %vm279_vm0, %v1716_v16  ;;  %1669 = vmatprep.mubr.msk.bf16.mxu1 %vm279_vm0, %v1717_v17 }
  0x24   :  { %8 = vsyncpa [#allocation3], 0  ;;  %v1718_v18 = vld [vmem:[%s2014_s0 + $0x38] sm:$0xff]   ;;  %v1720_v20 = vld [vmem:[%s2014_s0 + $0x40] sm:$0xff]  }
  0x25   :  { %v1719_v19 = vld [vmem:[%s2014_s0 + $0xb8] sm:$0xff]   ;;  %v1721_v21 = vld [vmem:[%s2014_s0 + $0xc0] sm:$0xff]   ;;  %v1722_v22 = vld [vmem:[%s2014_s0 + $0x48] sm:$0xff]  }
  0x26   :  { %v1723_v23 = vld [vmem:[%s2014_s0 + $0xc8] sm:$0xff]   ;;  %v1724_v24 = vld [vmem:[%s2014_s0 + $0x50] sm:$0xff]   ;;  %v1726_v26 = vld [vmem:[%s2014_s0 + $0x58] sm:$0xff]  }
  0x27   :  { %v1725_v25 = vld [vmem:[%s2014_s0 + $0xd0] sm:$0xff]   ;;  %v1727_v27 = vld [vmem:[%s2014_s0 + $0xd8] sm:$0xff]   ;;  %v1728_v28 = vld [vmem:[%s2014_s0 + $0x60] sm:$0xff]  }
  0x28   :  { %v1729_v29 = vld [vmem:[%s2014_s0 + $0xe0] sm:$0xff]   ;;  %v1730_v30 = vld [vmem:[%s2014_s0 + $0x68] sm:$0xff]   ;;  %v1732_v32 = vld [vmem:[%s2014_s0 + $0x70] sm:$0xff]  }
  0x29   :  { %v1731_v31 = vld [vmem:[%s2014_s0 + $0xe8] sm:$0xff]   ;;  %v1733_v33 = vld [vmem:[%s2014_s0 + $0xf0] sm:$0xff]   ;;  %v1734_v34 = vld [vmem:[%s2014_s0 + $0x78] sm:$0xff]  }
  0x2a   :  { %1638 = vmatmul.mubr.msk.bf16.gmra.mrb[12].mxu0 %vm279_vm0, %v1718_v18  ;;  %1670 = vmatmul.mubr.msk.bf16.gmra.mrb[12].mxu1 %vm279_vm0, %v1719_v19  ;;  %v1735_v35 = vld [vmem:[%s2014_s0 + $0xf8] sm:$0xff]   ;;  %v1926_v36 = vld [vmem:[%s2016_s2] ss:$0 sm:$0xff]  ;;  %s1760_s0 = smov [#allocation2]  }
  0x2b   :  { %1641 = vmatprep.mubr.msk.bf16.mxu0 %vm279_vm0, %v1720_v20  ;;  %1673 = vmatprep.mubr.msk.bf16.mxu1 %vm279_vm0, %v1721_v21  ;;  %s1182_s2 = sshll.u32 %s1760_s0, 4  ;;  %s1183_s2 = int_to_ptr.vmem [resolvable:$true] %s1182_s2 }
  0x2c   :  { %s1736_s1 = scalar_lea.vmem %s1183_s2, 4096  ;;  %p1741_p1 = scmp.lt.s32.totalorder %s1183_s2, %s1183_s2 }
  0x2d   :  { %p1737_p0 = scmp.ne.s32.totalorder %s1183_s2, %s1736_s1  ;;  %p1742_p2 = scmp.lt.s32.totalorder %s1736_s1, %s1736_s1 }
  0x2f   :  { %p1743_p3 = por %p1742_p2, %p1741_p1 }
  0x31   :  { %p1744_p4 = pnand %p1743_p3, %p1737_p0 }
  0x32   :  { %1642 = vmatmul.mubr.msk.bf16.gmra.mrb[16].mxu0 %vm279_vm0, %v1722_v22  ;;  %1674 = vmatmul.mubr.msk.bf16.gmra.mrb[16].mxu1 %vm279_vm0, %v1723_v23 }
  0x33   :  { %1645 = vmatprep.mubr.msk.bf16.mxu0 %vm279_vm0, %v1724_v24  ;;  %1677 = vmatprep.mubr.msk.bf16.mxu1 %vm279_vm0, %v1725_v25 }
  0x3a   :  { %1646 = vmatmul.mubr.msk.bf16.gmra.mrb[20].mxu0 %vm279_vm0, %v1726_v26  ;;  %1678 = vmatmul.mubr.msk.bf16.gmra.mrb[20].mxu1 %vm279_vm0, %v1727_v27 }
  0x3b   :  { %1649 = vmatprep.mubr.msk.bf16.mxu0 %vm279_vm0, %v1728_v28  ;;  %1681 = vmatprep.mubr.msk.bf16.mxu1 %vm279_vm0, %v1729_v29 }
  0x42   :  { %1650 = vmatmul.mubr.msk.bf16.gmra.mrb[24].mxu0 %vm279_vm0, %v1730_v30  ;;  %1682 = vmatmul.mubr.msk.bf16.gmra.mrb[24].mxu1 %vm279_vm0, %v1731_v31 }
  0x43   :  { %1653 = vmatprep.mubr.msk.bf16.mxu0 %vm279_vm0, %v1732_v32  ;;  %1685 = vmatprep.mubr.msk.bf16.mxu1 %vm279_vm0, %v1733_v33 }
  0x4a   :  { %1654 = vmatmul.mubr.msk.bf16.gmra.mrb[28].mxu0 %vm279_vm0, %v1734_v34  ;;  %1686 = vmatmul.mubr.msk.bf16.gmra.mrb[28].mxu1 %vm279_vm0, %v1735_v35 }
  0xe5   :  { %v1627_v37 = vpop.f32.mrb[0].mxu0  ;;  %v1659_v38 = vpop.f32.mrb[0].mxu1 }
  0xe6   :  { %v419_v39 = vadd.f32 %v1627_v37, %v1926_v36  ;;  %v547_v40 = vadd.f32 %v1659_v38, %v1926_v36  ;;  %v410_v41 = vpop.f32.mrb[1].mxu0  ;;  %v538_v42 = vpop.f32.mrb[1].mxu1 }
  0xe7   :  { %v411_v43 = vadd.f32 %v1926_v36, %v410_v41  ;;  %v539_v44 = vadd.f32 %v1926_v36, %v538_v42  ;;  %v1628_v45 = vpop.f32.mrb[2].mxu0  ;;  %v1660_v46 = vpop.f32.mrb[2].mxu1 }
  0xe8   :  { %vm667_vm1 = vcmp.ge.f32.partialorder %v419_v39, 0.0  ;;  %v731_v47 = vmul.f32 0.2, %v419_v39  ;;  %vm699_vm2 = vcmp.ge.f32.partialorder %v547_v40, 0.0  ;;  %v763_v48 = vmul.f32 0.2, %v547_v40 }
  0xe9   :  { %vm665_vm3 = vcmp.ge.f32.partialorder %v411_v43, 0.0  ;;  %v729_v49 = vmul.f32 0.2, %v411_v43  ;;  %vm697_vm4 = vcmp.ge.f32.partialorder %v539_v44, 0.0  ;;  %v761_v50 = vmul.f32 0.2, %v539_v44 }
  0xea   :  { %v422_v51 = vadd.f32 %v1628_v45, %v1926_v36  ;;  %v550_v52 = vadd.f32 %v1660_v46, %v1926_v36  ;;  %v413_v53 = vpop.f32.mrb[3].mxu0  ;;  %v541_v54 = vpop.f32.mrb[3].mxu1  ;;  %v795_v55 = vsel %vm667_vm1, %v419_v39, %v731_v47  ;;  %v827_v56 = vsel %vm699_vm2, %v547_v40, %v763_v48 }
  0xeb   :  { %v414_v57 = vadd.f32 %v1926_v36, %v413_v53  ;;  %v542_v58 = vadd.f32 %v1926_v36, %v541_v54  ;;  %v793_v63 = vsel %vm665_vm3, %v411_v43, %v729_v49  ;;  %v825_v0 = vsel %vm697_vm4, %v539_v44, %v761_v50 }
  0xec   :  { %vm668_vm5 = vcmp.ge.f32.partialorder %v422_v51, 0.0  ;;  %v732_v59 = vmul.f32 0.2, %v422_v51  ;;  %vm700_vm6 = vcmp.ge.f32.partialorder %v550_v52, 0.0  ;;  %v764_v60 = vmul.f32 0.2, %v550_v52 }
  0xed   :  { %vm666_vm7 = vcmp.ge.f32.partialorder %v414_v57, 0.0  ;;  %v730_v61 = vmul.f32 0.2, %v414_v57  ;;  %vm698_vm8 = vcmp.ge.f32.partialorder %v542_v58, 0.0  ;;  %v762_v62 = vmul.f32 0.2, %v542_v58 }
  0xee   :  { %v796_v1 = vsel %vm668_vm5, %v422_v51, %v732_v59  ;;  %v828_v2 = vsel %vm700_vm6, %v550_v52, %v764_v60  ;;  %v1631_v3 = vpop.f32.mrb[4].mxu0  ;;  %v1663_v4 = vpop.f32.mrb[4].mxu1 }
  0xef   :  { %v1398_v5 = vpack.c.bf16 %v796_v1, %v795_v55  ;;  %v1478_v6 = vpack.c.bf16 %v828_v2, %v827_v56  ;;  %v794_v7 = vsel %vm666_vm7, %v414_v57, %v730_v61  ;;  %v826_v8 = vsel %vm698_vm8, %v542_v58, %v762_v62  ;;  %v426_v9 = vpop.f32.mrb[5].mxu0  ;;  %v554_v10 = vpop.f32.mrb[5].mxu1 }
  0xf0   :  { %v1393_v11 = vpack.c.bf16 %v794_v7, %v793_v63  ;;  %v1473_v12 = vpack.c.bf16 %v826_v8, %v825_v0  ;;  %v435_v13 = vadd.f32 %v1631_v3, %v1926_v36  ;;  %v563_v14 = vadd.f32 %v1663_v4, %v1926_v36  ;;  %v1632_v15 = vpop.f32.mrb[6].mxu0  ;;  %v1664_v16 = vpop.f32.mrb[6].mxu1 }
  0xf1   :  { %1550 = vst [vmem:[#allocation2 + $0x8] sm:$0xff] %v1398_v5   ;;  %1566 = vst [vmem:[#allocation2 + $0x88] sm:$0xff] %v1478_v6   ;;  %v427_v17 = vadd.f32 %v1926_v36, %v426_v9  ;;  %v555_v18 = vadd.f32 %v1926_v36, %v554_v10  ;;  %v438_v19 = vadd.f32 %v1632_v15, %v1926_v36  ;;  %v429_v21 = vpop.f32.mrb[7].mxu0  ;;  %v557_v22 = vpop.f32.mrb[7].mxu1 }
  0xf2   :  { %v566_v20 = vadd.f32 %v1664_v16, %v1926_v36  ;;  %1394 = vst [vmem:[#allocation2] sm:$0xff] %v1393_v11   ;;  %1565 = vst [vmem:[#allocation2 + $0x80] sm:$0xff] %v1473_v12   ;;  %vm671_vm9 = vcmp.ge.f32.partialorder %v435_v13, 0.0  ;;  %v735_v23 = vmul.f32 0.2, %v435_v13  ;;  %vm703_vm10 = vcmp.ge.f32.partialorder %v563_v14, 0.0 }
  0xf3   :  { %v767_v24 = vmul.f32 0.2, %v563_v14  ;;  %vm669_vm11 = vcmp.ge.f32.partialorder %v427_v17, 0.0  ;;  %v733_v25 = vmul.f32 0.2, %v427_v17  ;;  %vm701_vm12 = vcmp.ge.f32.partialorder %v555_v18, 0.0 }
  0xf4   :  { %v765_v26 = vmul.f32 0.2, %v555_v18  ;;  %v799_v27 = vsel %vm671_vm9, %v435_v13, %v735_v23  ;;  %vm672_vm13 = vcmp.ge.f32.partialorder %v438_v19, 0.0  ;;  %v736_v29 = vmul.f32 0.2, %v438_v19 }
  0xf5   :  { %v831_v28 = vsel %vm703_vm10, %v563_v14, %v767_v24  ;;  %v797_v30 = vsel %vm669_vm11, %v427_v17, %v733_v25  ;;  %vm704_vm14 = vcmp.ge.f32.partialorder %v566_v20, 0.0  ;;  %v768_v32 = vmul.f32 0.2, %v566_v20  ;;  %v1635_v33 = vpop.f32.mrb[8].mxu0  ;;  %v1667_v34 = vpop.f32.mrb[8].mxu1 }
  0xf6   :  { %v829_v31 = vsel %vm701_vm12, %v555_v18, %v765_v26  ;;  %v800_v35 = vsel %vm672_vm13, %v438_v19, %v736_v29  ;;  %v430_v37 = vadd.f32 %v1926_v36, %v429_v21  ;;  %v558_v38 = vadd.f32 %v1926_v36, %v557_v22  ;;  %v442_v40 = vpop.f32.mrb[9].mxu0  ;;  %v570_v41 = vpop.f32.mrb[9].mxu1 }
  0xf7   :  { %v451_v39 = vadd.f32 %v1635_v33, %v1926_v36  ;;  %v1408_v42 = vpack.c.bf16 %v800_v35, %v799_v27  ;;  %v832_v43 = vsel %vm704_vm14, %v566_v20, %v768_v32  ;;  %v579_v44 = vadd.f32 %v1667_v34, %v1926_v36  ;;  %v1636_v46 = vpop.f32.mrb[10].mxu0  ;;  %v1668_v47 = vpop.f32.mrb[10].mxu1 }
  0xf8   :  { %v443_v45 = vadd.f32 %v1926_v36, %v442_v40  ;;  %v1488_v48 = vpack.c.bf16 %v832_v43, %v831_v28  ;;  %vm670_vm15 = vcmp.ge.f32.partialorder %v430_v37, 0.0  ;;  %v734_v49 = vmul.f32 0.2, %v430_v37  ;;  %v445_v50 = vpop.f32.mrb[11].mxu0  ;;  %v573_v51 = vpop.f32.mrb[11].mxu1 }
  0xf9   :  { %vm702_vm0 = vcmp.ge.f32.partialorder %v558_v38, 0.0  ;;  %1552 = vst [vmem:[#allocation2 + $0x18] sm:$0xff] %v1408_v42   ;;  %v766_v52 = vmul.f32 0.2, %v558_v38  ;;  %vm675_vm1 = vcmp.ge.f32.partialorder %v451_v39, 0.0  ;;  %vm707_vm2 = vcmp.ge.f32.partialorder %v579_v44, 0.0 }
  0xfa   :  { %v739_v53 = vmul.f32 0.2, %v451_v39  ;;  %1568 = vst [vmem:[#allocation2 + $0x98] sm:$0xff] %v1488_v48   ;;  %v798_v54 = vsel %vm670_vm15, %v430_v37, %v734_v49  ;;  %v771_v55 = vmul.f32 0.2, %v579_v44  ;;  %vm673_vm3 = vcmp.ge.f32.partialorder %v443_v45, 0.0 }
  0xfb   :  { %v737_v56 = vmul.f32 0.2, %v443_v45  ;;  %v1403_v57 = vpack.c.bf16 %v798_v54, %v797_v30  ;;  %v830_v58 = vsel %vm702_vm0, %v558_v38, %v766_v52  ;;  %v571_v60 = vadd.f32 %v1926_v36, %v570_v41 }
  0xfc   :  { %v803_v59 = vsel %vm675_vm1, %v451_v39, %v739_v53  ;;  %v1483_v61 = vpack.c.bf16 %v830_v58, %v829_v31  ;;  %v835_v62 = vsel %vm707_vm2, %v579_v44, %v771_v55  ;;  %v454_v0 = vadd.f32 %v1636_v46, %v1926_v36 }
  0xfd   :  { %v801_v63 = vsel %vm673_vm3, %v443_v45, %v737_v56  ;;  %1551 = vst [vmem:[#allocation2 + $0x10] sm:$0xff] %v1403_v57   ;;  %vm705_vm4 = vcmp.ge.f32.partialorder %v571_v60, 0.0  ;;  %v769_v1 = vmul.f32 0.2, %v571_v60  ;;  %v582_v2 = vadd.f32 %v1668_v47, %v1926_v36  ;;  %v1639_v4 = vpop.f32.mrb[12].mxu0  ;;  %v1671_v5 = vpop.f32.mrb[12].mxu1 }
  0xfe   :  { %v446_v3 = vadd.f32 %v1926_v36, %v445_v50  ;;  %1567 = vst [vmem:[#allocation2 + $0x90] sm:$0xff] %v1483_v61   ;;  %vm676_vm5 = vcmp.ge.f32.partialorder %v454_v0, 0.0  ;;  %v740_v6 = vmul.f32 0.2, %v454_v0  ;;  %v574_v7 = vadd.f32 %v1926_v36, %v573_v51  ;;  %v458_v9 = vpop.f32.mrb[13].mxu0  ;;  %v586_v10 = vpop.f32.mrb[13].mxu1 }
  0xff   :  { %v467_v8 = vadd.f32 %v1639_v4, %v1926_v36  ;;  %v833_v11 = vsel %vm705_vm4, %v571_v60, %v769_v1  ;;  %vm708_vm6 = vcmp.ge.f32.partialorder %v582_v2, 0.0  ;;  %v772_v12 = vmul.f32 0.2, %v582_v2  ;;  %v1640_v13 = vpop.f32.mrb[14].mxu0  ;;  %v1672_v14 = vpop.f32.mrb[14].mxu1 }
 0x100   :  { %vm674_vm7 = vcmp.ge.f32.partialorder %v446_v3, 0.0  ;;  %v804_v15 = vsel %vm676_vm5, %v454_v0, %v740_v6  ;;  %v738_v16 = vmul.f32 0.2, %v446_v3  ;;  %vm706_vm8 = vcmp.ge.f32.partialorder %v574_v7, 0.0  ;;  %v461_v18 = vpop.f32.mrb[15].mxu0  ;;  %v589_v22 = vpop.f32.mrb[15].mxu1 }
 0x101   :  { %v770_v17 = vmul.f32 0.2, %v574_v7  ;;  %v1418_v19 = vpack.c.bf16 %v804_v15, %v803_v59  ;;  %v836_v20 = vsel %vm708_vm6, %v582_v2, %v772_v12  ;;  %vm679_vm9 = vcmp.ge.f32.partialorder %v467_v8, 0.0 }
 0x102   :  { %v743_v21 = vmul.f32 0.2, %v467_v8  ;;  %v1498_v23 = vpack.c.bf16 %v836_v20, %v835_v62  ;;  %v802_v24 = vsel %vm674_vm7, %v446_v3, %v738_v16  ;;  %v595_v26 = vadd.f32 %v1671_v5, %v1926_v36 }
 0x103   :  { %v834_v25 = vsel %vm706_vm8, %v574_v7, %v770_v17  ;;  %1554 = vst [vmem:[#allocation2 + $0x28] sm:$0xff] %v1418_v19   ;;  %v1413_v27 = vpack.c.bf16 %v802_v24, %v801_v63  ;;  %v459_v30 = vadd.f32 %v1926_v36, %v458_v9  ;;  %v587_v32 = vadd.f32 %v1926_v36, %v586_v10 }
 0x104   :  { %v1493_v28 = vpack.c.bf16 %v834_v25, %v833_v11  ;;  %v807_v29 = vsel %vm679_vm9, %v467_v8, %v743_v21  ;;  %1570 = vst [vmem:[#allocation2 + $0xa8] sm:$0xff] %v1498_v23   ;;  %vm711_vm10 = vcmp.ge.f32.partialorder %v595_v26, 0.0  ;;  %v775_v31 = vmul.f32 0.2, %v595_v26 }
 0x105   :  { %v470_v33 = vadd.f32 %v1640_v13, %v1926_v36  ;;  %1553 = vst [vmem:[#allocation2 + $0x20] sm:$0xff] %v1413_v27   ;;  %vm677_vm11 = vcmp.ge.f32.partialorder %v459_v30, 0.0  ;;  %v741_v34 = vmul.f32 0.2, %v459_v30  ;;  %v598_v35 = vadd.f32 %v1672_v14, %v1926_v36  ;;  %v1643_v38 = vpop.f32.mrb[16].mxu0  ;;  %v1675_v39 = vpop.f32.mrb[16].mxu1 }
 0x106   :  { %1569 = vst [vmem:[#allocation2 + $0xa0] sm:$0xff] %v1493_v28   ;;  %v462_v37 = vadd.f32 %v1926_v36, %v461_v18  ;;  %v839_v40 = vsel %vm711_vm10, %v595_v26, %v775_v31  ;;  %vm709_vm12 = vcmp.ge.f32.partialorder %v587_v32, 0.0  ;;  %v773_v41 = vmul.f32 0.2, %v587_v32  ;;  %v474_v42 = vpop.f32.mrb[17].mxu0  ;;  %v602_v43 = vpop.f32.mrb[17].mxu1 }
 0x107   :  { %vm680_vm13 = vcmp.ge.f32.partialorder %v470_v33, 0.0  ;;  %v805_v44 = vsel %vm677_vm11, %v459_v30, %v741_v34  ;;  %v744_v45 = vmul.f32 0.2, %v470_v33  ;;  %vm712_vm14 = vcmp.ge.f32.partialorder %v598_v35, 0.0  ;;  %v1644_v47 = vpop.f32.mrb[18].mxu0  ;;  %v1676_v51 = vpop.f32.mrb[18].mxu1 }
 0x108   :  { %v776_v46 = vmul.f32 0.2, %v598_v35  ;;  %v837_v48 = vsel %vm709_vm12, %v587_v32, %v773_v41  ;;  %vm678_vm15 = vcmp.ge.f32.partialorder %v462_v37, 0.0  ;;  %v742_v49 = vmul.f32 0.2, %v462_v37  ;;  %v477_v52 = vpop.f32.mrb[19].mxu0 }
 0x109   :  { %v590_v50 = vadd.f32 %v1926_v36, %v589_v22  ;;  %v808_v53 = vsel %vm680_vm13, %v470_v33, %v744_v45  ;;  %v483_v55 = vadd.f32 %v1643_v38, %v1926_v36  ;;  %v611_v56 = vadd.f32 %v1675_v39, %v1926_v36  ;;  %v605_v57 = vpop.f32.mrb[19].mxu1 }
 0x10a   :  { %v840_v54 = vsel %vm712_vm14, %v598_v35, %v776_v46  ;;  %v1428_v58 = vpack.c.bf16 %v808_v53, %v807_v29  ;;  %v806_v60 = vsel %vm678_vm15, %v462_v37, %v742_v49  ;;  %v475_v1 = vadd.f32 %v1926_v36, %v474_v42 }
 0x10b   :  { %v1508_v59 = vpack.c.bf16 %v840_v54, %v839_v40  ;;  %vm710_vm0 = vcmp.ge.f32.partialorder %v590_v50, 0.0  ;;  %v1423_v61 = vpack.c.bf16 %v806_v60, %v805_v44  ;;  %v774_v62 = vmul.f32 0.2, %v590_v50 }
 0x10c   :  { %vm683_vm1 = vcmp.ge.f32.partialorder %v483_v55, 0.0  ;;  %v747_v63 = vmul.f32 0.2, %v483_v55  ;;  %1556 = vst [vmem:[#allocation2 + $0x38] sm:$0xff] %v1428_v58   ;;  %vm715_vm2 = vcmp.ge.f32.partialorder %v611_v56, 0.0  ;;  %v603_v2 = vadd.f32 %v1926_v36, %v602_v43 }
 0x10d   :  { %1572 = vst [vmem:[#allocation2 + $0xb8] sm:$0xff] %v1508_v59   ;;  %v779_v0 = vmul.f32 0.2, %v611_v56  ;;  %1555 = vst [vmem:[#allocation2 + $0x30] sm:$0xff] %v1423_v61   ;;  %v838_v3 = vsel %vm710_vm0, %v590_v50, %v774_v62  ;;  %v486_v5 = vadd.f32 %v1644_v47, %v1926_v36  ;;  %v614_v6 = vadd.f32 %v1676_v51, %v1926_v36  ;;  %v1647_v7 = vpop.f32.mrb[20].mxu0  ;;  %v1679_v8 = vpop.f32.mrb[20].mxu1 }
 0x10e   :  { %v811_v4 = vsel %vm683_vm1, %v483_v55, %v747_v63  ;;  %v1503_v9 = vpack.c.bf16 %v838_v3, %v837_v48  ;;  %vm681_vm3 = vcmp.ge.f32.partialorder %v475_v1, 0.0  ;;  %v745_v11 = vmul.f32 0.2, %v475_v1  ;;  %v490_v12 = vpop.f32.mrb[21].mxu0  ;;  %v618_v13 = vpop.f32.mrb[21].mxu1 }
 0x10f   :  { %v843_v10 = vsel %vm715_vm2, %v611_v56, %v779_v0  ;;  %vm713_vm4 = vcmp.ge.f32.partialorder %v603_v2, 0.0  ;;  %v777_v14 = vmul.f32 0.2, %v603_v2  ;;  %vm684_vm5 = vcmp.ge.f32.partialorder %v486_v5, 0.0  ;;  %v1648_v19 = vpop.f32.mrb[22].mxu0  ;;  %v1680_v20 = vpop.f32.mrb[22].mxu1 }
 0x110   :  { %v748_v15 = vmul.f32 0.2, %v486_v5  ;;  %1571 = vst [vmem:[#allocation2 + $0xb0] sm:$0xff] %v1503_v9   ;;  %v809_v16 = vsel %vm681_vm3, %v475_v1, %v745_v11  ;;  %vm716_vm6 = vcmp.ge.f32.partialorder %v614_v6, 0.0  ;;  %v780_v17 = vmul.f32 0.2, %v614_v6 }
 0x111   :  { %v478_v18 = vadd.f32 %v1926_v36, %v477_v52  ;;  %v841_v21 = vsel %vm713_vm4, %v603_v2, %v777_v14  ;;  %v606_v23 = vadd.f32 %v1926_v36, %v605_v57  ;;  %v499_v24 = vadd.f32 %v1647_v7, %v1926_v36  ;;  %v493_v25 = vpop.f32.mrb[23].mxu0  ;;  %v621_v26 = vpop.f32.mrb[23].mxu1 }
 0x112   :  { %v812_v22 = vsel %vm684_vm5, %v486_v5, %v748_v15  ;;  %v844_v28 = vsel %vm716_vm6, %v614_v6, %v780_v17  ;;  %v627_v34 = vadd.f32 %v1679_v8, %v1926_v36  ;;  %v491_v35 = vadd.f32 %v1926_v36, %v490_v12 }
 0x113   :  { %v1438_v27 = vpack.c.bf16 %v812_v22, %v811_v4  ;;  %vm682_vm7 = vcmp.ge.f32.partialorder %v478_v18, 0.0  ;;  %v746_v29 = vmul.f32 0.2, %v478_v18  ;;  %v1518_v30 = vpack.c.bf16 %v844_v28, %v843_v10 }
 0x114   :  { %vm714_vm8 = vcmp.ge.f32.partialorder %v606_v23, 0.0  ;;  %v778_v31 = vmul.f32 0.2, %v606_v23  ;;  %vm687_vm9 = vcmp.ge.f32.partialorder %v499_v24, 0.0  ;;  %v751_v33 = vmul.f32 0.2, %v499_v24 }
 0x115   :  { %1558 = vst [vmem:[#allocation2 + $0x48] sm:$0xff] %v1438_v27   ;;  %v810_v32 = vsel %vm682_vm7, %v478_v18, %v746_v29  ;;  %1574 = vst [vmem:[#allocation2 + $0xc8] sm:$0xff] %v1518_v30   ;;  %v619_v39 = vadd.f32 %v1926_v36, %v618_v13  ;;  %v502_v40 = vadd.f32 %v1648_v19, %v1926_v36  ;;  %v1651_v41 = vpop.f32.mrb[24].mxu0  ;;  %v1683_v42 = vpop.f32.mrb[24].mxu1  ;;  %vm719_vm10 = vcmp.ge.f32.partialorder %v627_v34, 0.0 }
 0x116   :  { %v1433_v37 = vpack.c.bf16 %v810_v32, %v809_v16  ;;  %v842_v38 = vsel %vm714_vm8, %v606_v23, %v778_v31  ;;  %v783_v44 = vmul.f32 0.2, %v627_v34  ;;  %v506_v45 = vpop.f32.mrb[25].mxu0  ;;  %v634_v46 = vpop.f32.mrb[25].mxu1  ;;  %v815_v47 = vsel %vm687_vm9, %v499_v24, %v751_v33 }
 0x117   :  { %v1513_v43 = vpack.c.bf16 %v842_v38, %v841_v21  ;;  %vm685_vm11 = vcmp.ge.f32.partialorder %v491_v35, 0.0  ;;  %v749_v48 = vmul.f32 0.2, %v491_v35  ;;  %v781_v49 = vmul.f32 0.2, %v619_v39  ;;  %v1652_v52 = vpop.f32.mrb[26].mxu0 }
 0x118   :  { %1557 = vst [vmem:[#allocation2 + $0x40] sm:$0xff] %v1433_v37   ;;  %vm717_vm12 = vcmp.ge.f32.partialorder %v619_v39, 0.0  ;;  %vm688_vm13 = vcmp.ge.f32.partialorder %v502_v40, 0.0  ;;  %v752_v50 = vmul.f32 0.2, %v502_v40  ;;  %v630_v51 = vadd.f32 %v1680_v20, %v1926_v36  ;;  %v1684_v53 = vpop.f32.mrb[26].mxu1 }
 0x119   :  { %1573 = vst [vmem:[#allocation2 + $0xc0] sm:$0xff] %v1513_v43   ;;  %v847_v54 = vsel %vm719_vm10, %v627_v34, %v783_v44  ;;  %v813_v55 = vsel %vm685_vm11, %v491_v35, %v749_v48  ;;  %v494_v56 = vadd.f32 %v1926_v36, %v493_v25  ;;  %v622_v57 = vadd.f32 %v1926_v36, %v621_v26  ;;  %v509_v58 = vpop.f32.mrb[27].mxu0  ;;  %v637_v59 = vpop.f32.mrb[27].mxu1 }
 0x11a   :  { %v816_v60 = vsel %vm688_vm13, %v502_v40, %v752_v50  ;;  %vm720_vm14 = vcmp.ge.f32.partialorder %v630_v51, 0.0  ;;  %v784_v61 = vmul.f32 0.2, %v630_v51  ;;  %v515_v62 = vadd.f32 %v1651_v41, %v1926_v36 }
 0x11b   :  { %v1448_v63 = vpack.c.bf16 %v816_v60, %v815_v47  ;;  %vm686_vm15 = vcmp.ge.f32.partialorder %v494_v56, 0.0  ;;  %v750_v0 = vmul.f32 0.2, %v494_v56  ;;  %vm718_vm0 = vcmp.ge.f32.partialorder %v622_v57, 0.0 }
 0x11c   :  { %v848_v1 = vsel %vm720_vm14, %v630_v51, %v784_v61  ;;  %v782_v2 = vmul.f32 0.2, %v622_v57  ;;  %vm691_vm1 = vcmp.ge.f32.partialorder %v515_v62, 0.0  ;;  %v755_v3 = vmul.f32 0.2, %v515_v62 }
 0x11d   :  { %1560 = vst [vmem:[#allocation2 + $0x58] sm:$0xff] %v1448_v63   ;;  %v1528_v4 = vpack.c.bf16 %v848_v1, %v847_v54  ;;  %v814_v5 = vsel %vm686_vm15, %v494_v56, %v750_v0  ;;  %v643_v6 = vadd.f32 %v1683_v42, %v1926_v36  ;;  %v507_v7 = vadd.f32 %v1926_v36, %v506_v45  ;;  %v1655_v8 = vpop.f32.mrb[28].mxu0  ;;  %v1687_v9 = vpop.f32.mrb[28].mxu1 }
 0x11e   :  { %v845_v10 = vsel %vm717_vm12, %v619_v39, %v781_v49  ;;  %v1443_v11 = vpack.c.bf16 %v814_v5, %v813_v55  ;;  %v846_v12 = vsel %vm718_vm0, %v622_v57, %v782_v2  ;;  %v635_v13 = vadd.f32 %v1926_v36, %v634_v46  ;;  %v522_v14 = vpop.f32.mrb[29].mxu0  ;;  %v650_v15 = vpop.f32.mrb[29].mxu1 }
 0x11f   :  { %1576 = vst [vmem:[#allocation2 + $0xd8] sm:$0xff] %v1528_v4   ;;  %v1523_v16 = vpack.c.bf16 %v846_v12, %v845_v10  ;;  %vm723_vm2 = vcmp.ge.f32.partialorder %v643_v6, 0.0  ;;  %v787_v17 = vmul.f32 0.2, %v643_v6  ;;  %vm689_vm3 = vcmp.ge.f32.partialorder %v507_v7, 0.0  ;;  %v1656_v18 = vpop.f32.mrb[30].mxu0 }
 0x120   :  { %v1688_v19 = vpop.f32.mrb[30].mxu1  ;;  %1559 = vst [vmem:[#allocation2 + $0x50] sm:$0xff] %v1443_v11   ;;  %v819_v20 = vsel %vm691_vm1, %v515_v62, %v755_v3  ;;  %v753_v21 = vmul.f32 0.2, %v507_v7  ;;  %vm721_vm4 = vcmp.ge.f32.partialorder %v635_v13, 0.0  ;;  %v518_v22 = vadd.f32 %v1652_v52, %v1926_v36  ;;  %v525_v23 = vpop.f32.mrb[31].mxu0 }
 0x121   :  { %1575 = vst [vmem:[#allocation2 + $0xd0] sm:$0xff] %v1523_v16   ;;  %v785_v24 = vmul.f32 0.2, %v635_v13  ;;  %v646_v25 = vadd.f32 %v1684_v53, %v1926_v36  ;;  %v510_v26 = vadd.f32 %v1926_v36, %v509_v58  ;;  %v638_v27 = vadd.f32 %v1926_v36, %v637_v59  ;;  %v653_v28 = vpop.f32.mrb[31].mxu1 }
 0x122   :  { %v851_v29 = vsel %vm723_vm2, %v643_v6, %v787_v17  ;;  %v817_v30 = vsel %vm689_vm3, %v507_v7, %v753_v21  ;;  %vm692_vm5 = vcmp.ge.f32.partialorder %v518_v22, 0.0  ;;  %v756_v31 = vmul.f32 0.2, %v518_v22 }
 0x123   :  { %vm724_vm6 = vcmp.ge.f32.partialorder %v646_v25, 0.0  ;;  %v788_v32 = vmul.f32 0.2, %v646_v25  ;;  %vm690_vm7 = vcmp.ge.f32.partialorder %v510_v26, 0.0  ;;  %v754_v33 = vmul.f32 0.2, %v510_v26 }
 0x124   :  { %v820_v34 = vsel %vm692_vm5, %v518_v22, %v756_v31  ;;  %vm722_vm8 = vcmp.ge.f32.partialorder %v638_v27, 0.0  ;;  %v786_v35 = vmul.f32 0.2, %v638_v27  ;;  %v531_v37 = vadd.f32 %v1655_v8, %v1926_v36 }
 0x125   :  { %v1458_v38 = vpack.c.bf16 %v820_v34, %v819_v20  ;;  %v852_v39 = vsel %vm724_vm6, %v646_v25, %v788_v32  ;;  %v818_v40 = vsel %vm690_vm7, %v510_v26, %v754_v33  ;;  %v659_v41 = vadd.f32 %v1687_v9, %v1926_v36 }
 0x126   :  { %v849_v42 = vsel %vm721_vm4, %v635_v13, %v785_v24  ;;  %v1538_v43 = vpack.c.bf16 %v852_v39, %v851_v29  ;;  %v1453_v44 = vpack.c.bf16 %v818_v40, %v817_v30  ;;  %v850_v45 = vsel %vm722_vm8, %v638_v27, %v786_v35 }
 0x127   :  { %1562 = vst [vmem:[#allocation2 + $0x68] sm:$0xff] %v1458_v38   ;;  %v1533_v46 = vpack.c.bf16 %v850_v45, %v849_v42  ;;  %vm695_vm9 = vcmp.ge.f32.partialorder %v531_v37, 0.0  ;;  %v759_v47 = vmul.f32 0.2, %v531_v37  ;;  %v791_v48 = vmul.f32 0.2, %v659_v41 }
 0x128   :  { %1578 = vst [vmem:[#allocation2 + $0xe8] sm:$0xff] %v1538_v43   ;;  %1561 = vst [vmem:[#allocation2 + $0x60] sm:$0xff] %v1453_v44   ;;  %v523_v49 = vadd.f32 %v1926_v36, %v522_v14  ;;  %v651_v50 = vadd.f32 %v1926_v36, %v650_v15  ;;  %v534_v51 = vadd.f32 %v1656_v18, %v1926_v36  ;;  %vm727_vm10 = vcmp.ge.f32.partialorder %v659_v41, 0.0 }
 0x129   :  { %v662_v52 = vadd.f32 %v1688_v19, %v1926_v36  ;;  %1577 = vst [vmem:[#allocation2 + $0xe0] sm:$0xff] %v1533_v46   ;;  %v526_v53 = vadd.f32 %v1926_v36, %v525_v23  ;;  %v654_v54 = vadd.f32 %v1926_v36, %v653_v28  ;;  %v823_v55 = vsel %vm695_vm9, %v531_v37, %v759_v47 }
 0x12a   :  { %vm693_vm11 = vcmp.ge.f32.partialorder %v523_v49, 0.0  ;;  %v757_v56 = vmul.f32 0.2, %v523_v49  ;;  %v789_v57 = vmul.f32 0.2, %v651_v50  ;;  %vm696_vm12 = vcmp.ge.f32.partialorder %v534_v51, 0.0 }
 0x12b   :  { %v760_v58 = vmul.f32 0.2, %v534_v51  ;;  %vm728_vm13 = vcmp.ge.f32.partialorder %v662_v52, 0.0  ;;  %v792_v59 = vmul.f32 0.2, %v662_v52  ;;  %v855_v60 = vsel %vm727_vm10, %v659_v41, %v791_v48 }
 0x12c   :  { %vm725_vm14 = vcmp.ge.f32.partialorder %v651_v50, 0.0  ;;  %vm694_vm15 = vcmp.ge.f32.partialorder %v526_v53, 0.0  ;;  %v758_v61 = vmul.f32 0.2, %v526_v53  ;;  %vm726_vm0 = vcmp.ge.f32.partialorder %v654_v54, 0.0 }
 0x12d   :  { %v824_v62 = vsel %vm696_vm12, %v534_v51, %v760_v58  ;;  %v856_v63 = vsel %vm728_vm13, %v662_v52, %v792_v59  ;;  %v790_v0 = vmul.f32 0.2, %v654_v54  ;;  %v821_v36 = vsel %vm693_vm11, %v523_v49, %v757_v56 }
 0x12e   :  { %v1468_v1 = vpack.c.bf16 %v824_v62, %v823_v55  ;;  %v1548_v2 = vpack.c.bf16 %v856_v63, %v855_v60  ;;  %v822_v3 = vsel %vm694_vm15, %v526_v53, %v758_v61  ;;  %v853_v4 = vsel %vm725_vm14, %v651_v50, %v789_v57 }
 0x12f   :  { %v1463_v5 = vpack.c.bf16 %v822_v3, %v821_v36  ;;  %v854_v6 = vsel %vm726_vm0, %v654_v54, %v790_v0 }
 0x130   :  { %1564 = vst [vmem:[#allocation2 + $0x78] sm:$0xff] %v1468_v1   ;;  %1580 = vst [vmem:[#allocation2 + $0xf8] sm:$0xff] %v1548_v2   ;;  %v1543_v7 = vpack.c.bf16 %v854_v6, %v853_v4 }
 0x131   :  { %1563 = vst [vmem:[#allocation2 + $0x70] sm:$0xff] %v1463_v5  }
 0x132   :  { %1579 = vst [vmem:[#allocation2 + $0xf0] sm:$0xff] %v1543_v7  }
 0x133   :  { %1747 = shalt.err (!%p1744_p4)
}
 0x134   :  { %s1748_s5 = scalar_lea.hbm %s2017_s3, 4096 }
 0x135   :  { %p1749_p5 = scmp.ne.s32.totalorder %s2017_s3, %s1748_s5  ;;  %p1752_p6 = scmp.lt.u32.totalorder %s1748_s5, %s2017_s3 }
 0x137   :  { %p1754_p7 = pnand %p1752_p6, %p1749_p5 }
 0x139   :  { %1757 = shalt.err (!%p1754_p7)
}
 0x13a   :  { %s1761_s10 = smov 64   ;;  %s1762_s11 = smov 4  }
 0x13b   :  { %1188 = dma.vmem_to_hbm [thread:$0]  %s1183_s2, 4096, %s2017_s3, [#allocation3], %s1761_s10, %s1761_s10, %s1762_s11  }
 0x13c   :  { %1758 = dma.done.wait [#allocation3], 4096  }
 0x13d   :  { %1759 = vsyncadd [#allocation3], 4294963200 }
 0x13e   :  { %1192 = vsyncpa [#allocation3], 1 }

</bundles_post_ra>
